<compile_context>
chip_gen: v5e
topology: v5e:2x2
jax: 0.10.0
libtpu: 0.0.40
codegen_flags: <defaults>
</compile_context>

<pallas_src>
import functools

import jax
import jax.numpy as jnp
from jax.experimental import pallas as pl
from jax.experimental.pallas import tpu as pltpu

_LANE = 128
_SUBLANE = 8
_BN_EPS = 1e-5


def _round_up(x, m):
    return ((x + m - 1) // m) * m


def _logit_kernel(x_ref, w_ref, b_ref, o_ref):
    # One MXU matmul + VPU bias add per (row_tile, C_pad) output block.
    o_ref[...] = (
        jnp.dot(x_ref[...], w_ref[...], preferred_element_type=jnp.float32)
        + b_ref[...]
    ).astype(o_ref.dtype)


def fold_params(params):
    """One-time fold of Linear(256,128) + BN(eval) + Linear(128,C) into (W, b).

    Returns W: (256, C_pad), b: (1, C_pad) with C padded to a multiple of 128
    (pad columns are zeros -> lane-dense output, sliced off in the wrapper).
    """
    scale = params["gamma"] * jax.lax.rsqrt(params["running_var"] + _BN_EPS)  # (1,128)
    w1p = params["w1"] * scale                                   # (256,128) col scale
    b1p = (params["b1"] - params["running_mean"]) * scale + params["beta"]    # (1,128)
    W = w1p @ params["w2"]                                       # (256, C)
    b = b1p @ params["w2"] + params["b2"]                        # (1, C)

    num_classes = W.shape[1]
    c_pad = _round_up(max(num_classes, _LANE), _LANE)
    W = jnp.pad(W, ((0, 0), (0, c_pad - num_classes)))
    b = jnp.pad(b, ((0, 0), (0, c_pad - num_classes)))
    # Note: once the workload is batched, W/x can be cast to bf16 (keep f32
    # accumulation via preferred_element_type) for the v6e/v7x MXU rate.
    return W.astype(jnp.float32), b.astype(jnp.float32), num_classes


@functools.partial(jax.jit, static_argnames=("timestep", "num_classes"))
def cpc_har_logit(c_t, W, b, *, timestep, num_classes):
    """c_t: (B, 256, T) float32. Returns logits (B, num_classes)."""
    # Direct last-axis slice: strided HBM read of B*256 elements, no transpose.
    x = jax.lax.index_in_dim(c_t, timestep, axis=2, keepdims=False)  # (B, 256)

    B, K = x.shape
    C_pad = W.shape[1]

    # Row tiling: pad B to the sublane granularity, pick a tile that divides it.
    B8 = _round_up(B, _SUBLANE)
    block_rows = min(512, B8)                 # (512,256)+(256,C_pad)+(512,C_pad) f32
    B_pad = _round_up(B8, block_rows)         # double-buffered ~1.3 MiB -> fits v5e
    x_pad = jnp.pad(x, ((0, B_pad - B), (0, 0)))

    grid = (B_pad // block_rows,)
    flops = 2 * B_pad * K * C_pad
    bytes_accessed = 4 * (B_pad * K + K * C_pad + C_pad + B_pad * C_pad)

    out = pl.pallas_call(
        _logit_kernel,
        out_shape=jax.ShapeDtypeStruct((B_pad, C_pad), jnp.float32),
        grid=grid,
        in_specs=[
            pl.BlockSpec((block_rows, K), lambda i: (i, 0)),   # activations, tiled
            pl.BlockSpec((K, C_pad), lambda i: (0, 0)),        # folded weight, resident
            pl.BlockSpec((1, C_pad), lambda i: (0, 0)),        # folded bias, resident
        ],
        out_specs=pl.BlockSpec((block_rows, C_pad), lambda i: (i, 0)),
        compiler_params=pltpu.CompilerParams(
            dimension_semantics=("parallel",),                 # shard rows across TCs
        ),
        cost_estimate=pl.CostEstimate(
            flops=flops, transcendentals=0, bytes_accessed=bytes_accessed
        ),
    )(x_pad, W, b)

    return out[:B, :num_classes]


def init_params(key, num_classes):
    """Deterministic parameter init matching nn.Linear / nn.BatchNorm1d shapes."""
    k1, k2, k3, k4, k5, k6 = jax.random.split(key, 6)
    # Linear(256, 128): torch weight (128, 256) -> stored transposed (256, 128)
    lim1 = 1.0 / jnp.sqrt(256.0)
    w1 = jax.random.uniform(k1, (256, 128), jnp.float32, -lim1, lim1)
    b1 = jax.random.uniform(k2, (1, 128), jnp.float32, -lim1, lim1)
    # BatchNorm1d(128), eval-mode stats
    gamma = jnp.ones((1, 128), jnp.float32)
    beta = jnp.zeros((1, 128), jnp.float32)
    running_mean = 0.1 * jax.random.normal(k3, (1, 128), jnp.float32)
    running_var = 1.0 + 0.1 * jax.random.uniform(k4, (1, 128), jnp.float32)
    # Linear(128, num_classes): torch weight (C, 128) -> stored transposed (128, C)
    lim2 = 1.0 / jnp.sqrt(128.0)
    w2 = jax.random.uniform(k5, (128, num_classes), jnp.float32, -lim2, lim2)
    b2 = jax.random.uniform(k6, (1, num_classes), jnp.float32, -lim2, lim2)
    return dict(w1=w1, b1=b1, gamma=gamma, beta=beta,
                running_mean=running_mean, running_var=running_var,
                w2=w2, b2=b2)


def _reference(c_t, params, *, timestep):
    """Unfolded pure-JAX reference matching the PyTorch module (eval mode)."""
    x = jnp.transpose(c_t, (0, 2, 1))[:, timestep, :]
    h = x @ params["w1"] + params["b1"]
    hn = ((h - params["running_mean"])
          * jax.lax.rsqrt(params["running_var"] + _BN_EPS)
          * params["gamma"] + params["beta"])
    return hn @ params["w2"] + params["b2"]


if __name__ == "__main__":
    key = jax.random.PRNGKey(0)
    k_in, k_p = jax.random.split(key)

    B, C_FEAT, T = 4, 256, 8       # c_t is (B, 256, T) as in the PyTorch module
    NUM_CLASSES = 6
    TIMESTEP = 4

    c_t = jax.random.normal(k_in, (B, C_FEAT, T), jnp.float32)
    params = init_params(k_p, NUM_CLASSES)

    W, b, num_classes = fold_params(params)
    out = cpc_har_logit(c_t, W, b, timestep=TIMESTEP, num_classes=num_classes)
    out = jax.block_until_ready(out)

    ref = _reference(c_t, params, timestep=TIMESTEP)
    assert out.shape == (B, NUM_CLASSES)
    assert jnp.allclose(out, ref, atol=1e-4, rtol=1e-4)

    print("KERNEL_OK")
</pallas_src>

<mosaic_0001>
module attributes {stable_mosaic.version = 11 : i64} {
  func.func @_logit_kernel(%arg0: i32, %arg1: memref<8x256xf32, #tpu.memory_space<vmem>>, %arg2: memref<256x128xf32, #tpu.memory_space<vmem>>, %arg3: memref<1x128xf32, #tpu.memory_space<vmem>>, %arg4: memref<8x128xf32, #tpu.memory_space<vmem>>) attributes {dimension_semantics = [#tpu.dimension_semantics<parallel>], iteration_bounds = array<i64: 1>, scalar_prefetch = 0 : i64, scratch_operands = 0 : i64, tpu.core_type = #tpu.core_type<tc>, window_params = [{transform_indices = @transform_0, window_bounds = array<i64: 8, 256>}, {pipeline_mode = #tpu.pipeline_mode<synchronous>, transform_indices = @transform_1, window_bounds = array<i64: 256, 128>}, {pipeline_mode = #tpu.pipeline_mode<synchronous>, transform_indices = @transform_2, window_bounds = array<i64: 1, 128>}, {transform_indices = @transform_3, window_bounds = array<i64: 8, 128>}]} {
    %c0 = arith.constant 0 : index
    %c0_0 = arith.constant 0 : index
    %0 = vector.load %arg1[%c0, %c0_0] : memref<8x256xf32, #tpu.memory_space<vmem>>, vector<8x256xf32>
    %c0_1 = arith.constant 0 : index
    %c0_2 = arith.constant 0 : index
    %1 = vector.load %arg2[%c0_1, %c0_2] : memref<256x128xf32, #tpu.memory_space<vmem>>, vector<256x128xf32>
    %cst = arith.constant dense<0.000000e+00> : vector<8x128xf32>
    %2 = tpu.matmul %0, %1, %cst {dimension_numbers = #tpu.dot_dimension_numbers<[1], [0], [0], [1], [0, 0, 1, 1], [], []>} : vector<8x256xf32>, vector<256x128xf32>, vector<8x128xf32> -> vector<8x128xf32>
    %c0_3 = arith.constant 0 : index
    %c0_4 = arith.constant 0 : index
    %3 = vector.load %arg3[%c0_3, %c0_4] : memref<1x128xf32, #tpu.memory_space<vmem>>, vector<1x128xf32>
    %4 = vector.broadcast %3 : vector<1x128xf32> to vector<8x128xf32>
    %5 = arith.addf %2, %4 : vector<8x128xf32>
    %c0_5 = arith.constant 0 : index
    %c0_6 = arith.constant 0 : index
    %6 = vector.load %arg4[%c0_5, %c0_6] : memref<8x128xf32, #tpu.memory_space<vmem>>, vector<8x128xf32>
    tpu.vector_store %arg4[%c0_5, %c0_6], %5 {strides = array<i32>} : memref<8x128xf32, #tpu.memory_space<vmem>>, vector<8x128xf32>,
    return
  }
  func.func @transform_0(%arg0: i32) -> (i32, i32) {
    %c0_i32 = arith.constant 0 : i32
    %c0_i32_0 = arith.constant 0 : i32
    return %arg0, %c0_i32 : i32, i32
  }
  func.func @transform_1(%arg0: i32) -> (i32, i32) {
    %c0_i32 = arith.constant 0 : i32
    %c0_i32_0 = arith.constant 0 : i32
    %c0_i32_1 = arith.constant 0 : i32
    return %c0_i32, %c0_i32_0 : i32, i32
  }
  func.func @transform_2(%arg0: i32) -> (i32, i32) {
    %c0_i32 = arith.constant 0 : i32
    %c0_i32_0 = arith.constant 0 : i32
    %c0_i32_1 = arith.constant 0 : i32
    return %c0_i32, %c0_i32_0 : i32, i32
  }
  func.func @transform_3(%arg0: i32) -> (i32, i32) {
    %c0_i32 = arith.constant 0 : i32
    %c0_i32_0 = arith.constant 0 : i32
    return %arg0, %c0_i32 : i32, i32
  }
}

</mosaic_0001>

<bundles_post_ra>
// kernel: cpc_har_logit.1
= control target key start
LH: loop header
LB: loop body
LE: loop exit
PB: predicated region body
PF: predicated region fallthrough
CT: control target
= control target key end

     0   :  { %8 = vsyncpa [#allocation3], 0  ;;  %s144_s15 = smov [#allocation2]   ;;  %s145_s17 = smov 128   ;;  %s182_s0 = inlined_call_operand.vmem [shape: f32[8,256], index: 0, kind: input, shape index: {}]   ;;  %s183_s1 = inlined_call_operand.hbm [shape: f32[256,128], index: 1, kind: input, shape index: {}]   ;;  %s184_s2 = inlined_call_operand.vmem [shape: f32[1,128], index: 2, kind: input, shape index: {}]   ;;  %s185_s3 = inlined_call_operand.vmem [shape: f32[8,128], index: 3, kind: output, shape index: {}]  }
   0x1   :  { %s15_s14 = sshll.u32 %s183_s1, 4  ;;  %s17_s16 = sshll.u32 %s144_s15, 4  ;;  %s16_s14 = int_to_ptr.hbm [resolvable:$true] %s15_s14  ;;  %s18_s16 = int_to_ptr.vmem [resolvable:$true] %s17_s16 }
   0x2   :  { %s146_s18 = smov 8  }
   0x3   :  { %23 = dma.hbm_to_vmem [thread:$0]  %s16_s14, 4096, %s18_s16, [#allocation3], %s145_s17, %s145_s17, %s146_s18  }
   0x4   :  { %142 = dma.done.wait [#allocation3], 4096  }
   0x5   :  { %143 = vsyncadd [#allocation3], 4294963200  ;;  %v47_v0 = vld [vmem:[#allocation2 + $0x78] sm:$0xff]  ;;  %v46_v1 = vld [vmem:[#allocation2 + $0x70] sm:$0xff] }
   0x6   :  { %v63_v2 = vld [vmem:[#allocation2 + $0xf8] sm:$0xff]  ;;  %68 = vmatpush.msra.mxu0 %v47_v0  ;;  %v62_v3 = vld [vmem:[#allocation2 + $0xf0] sm:$0xff]  ;;  %v45_v4 = vld [vmem:[#allocation2 + $0x68] sm:$0xff] }
   0x7   :  { %88 = vmatpush.msra.mxu1 %v63_v2  ;;  %v61_v5 = vld [vmem:[#allocation2 + $0xe8] sm:$0xff]  ;;  %v44_v6 = vld [vmem:[#allocation2 + $0x60] sm:$0xff]  ;;  %v43_v8 = vld [vmem:[#allocation2 + $0x58] sm:$0xff] }
   0x8   :  { %69 = vmatpush.msra.mxu0 %v46_v1  ;;  %v60_v7 = vld [vmem:[#allocation2 + $0xe0] sm:$0xff]  ;;  %v59_v9 = vld [vmem:[#allocation2 + $0xd8] sm:$0xff]  ;;  %v42_v10 = vld [vmem:[#allocation2 + $0x50] sm:$0xff] }
   0x9   :  { %89 = vmatpush.msra.mxu1 %v62_v3  ;;  %v58_v11 = vld [vmem:[#allocation2 + $0xd0] sm:$0xff]  ;;  %v41_v12 = vld [vmem:[#allocation2 + $0x48] sm:$0xff]  ;;  %v40_v14 = vld [vmem:[#allocation2 + $0x40] sm:$0xff] }
   0xa   :  { %70 = vmatpush.msra.mxu0 %v45_v4  ;;  %v57_v13 = vld [vmem:[#allocation2 + $0xc8] sm:$0xff]  ;;  %v56_v15 = vld [vmem:[#allocation2 + $0xc0] sm:$0xff]  ;;  %v39_v16 = vld [vmem:[#allocation2 + $0x38] sm:$0xff] }
   0xb   :  { %90 = vmatpush.msra.mxu1 %v61_v5  ;;  %v55_v17 = vld [vmem:[#allocation2 + $0xb8] sm:$0xff]  ;;  %v38_v18 = vld [vmem:[#allocation2 + $0x30] sm:$0xff]  ;;  %v37_v20 = vld [vmem:[#allocation2 + $0x28] sm:$0xff] }
   0xc   :  { %71 = vmatpush.msra.mxu0 %v44_v6  ;;  %v54_v19 = vld [vmem:[#allocation2 + $0xb0] sm:$0xff]  ;;  %v53_v21 = vld [vmem:[#allocation2 + $0xa8] sm:$0xff]  ;;  %v36_v22 = vld [vmem:[#allocation2 + $0x20] sm:$0xff] }
   0xd   :  { %91 = vmatpush.msra.mxu1 %v60_v7  ;;  %v52_v23 = vld [vmem:[#allocation2 + $0xa0] sm:$0xff]  ;;  %v35_v24 = vld [vmem:[#allocation2 + $0x18] sm:$0xff]  ;;  %v34_v26 = vld [vmem:[#allocation2 + $0x10] sm:$0xff] }
   0xe   :  { %72 = vmatpush.msra.mxu0 %v43_v8  ;;  %v51_v25 = vld [vmem:[#allocation2 + $0x98] sm:$0xff]  ;;  %v50_v27 = vld [vmem:[#allocation2 + $0x90] sm:$0xff]  ;;  %v33_v28 = vld [vmem:[#allocation2 + $0x8] sm:$0xff] }
   0xf   :  { %92 = vmatpush.msra.mxu1 %v59_v9  ;;  %v49_v29 = vld [vmem:[#allocation2 + $0x88] sm:$0xff]  ;;  %v32_v30 = vld [vmem:[#allocation2] sm:$0xff] }
  0x10   :  { %73 = vmatpush.msra.mxu0 %v42_v10  ;;  %v48_v31 = vld [vmem:[#allocation2 + $0x80] sm:$0xff]  ;;  %v31_v33 = vld [vmem:[%s182_s0 + $0x8] sm:$0xff] }
  0x11   :  { %93 = vmatpush.msra.mxu1 %v58_v11  ;;  %v30_v32 = vld [vmem:[%s182_s0] sm:$0xff] }
  0x12   :  { %74 = vmatpush.msra.mxu0 %v41_v12  ;;  %v117_v34 = vld [vmem:[%s184_s2] ss:$0 sm:$0xff] }
  0x13   :  { %94 = vmatpush.msra.mxu1 %v57_v13 }
  0x14   :  { %75 = vmatpush.msra.mxu0 %v40_v14 }
  0x15   :  { %95 = vmatpush.msra.mxu1 %v56_v15 }
  0x16   :  { %76 = vmatpush.msra.mxu0 %v39_v16 }
  0x17   :  { %96 = vmatpush.msra.mxu1 %v55_v17 }
  0x18   :  { %77 = vmatpush.msra.mxu0 %v38_v18 }
  0x19   :  { %97 = vmatpush.msra.mxu1 %v54_v19 }
  0x1a   :  { %78 = vmatpush.msra.mxu0 %v37_v20 }
  0x1b   :  { %98 = vmatpush.msra.mxu1 %v53_v21 }
  0x1c   :  { %79 = vmatpush.msra.mxu0 %v36_v22 }
  0x1d   :  { %99 = vmatpush.msra.mxu1 %v52_v23 }
  0x1e   :  { %80 = vmatpush.msra.mxu0 %v35_v24 }
  0x1f   :  { %100 = vmatpush.msra.mxu1 %v51_v25 }
  0x20   :  { %81 = vmatpush.msra.mxu0 %v34_v26 }
  0x21   :  { %101 = vmatpush.msra.mxu1 %v50_v27 }
  0x22   :  { %82 = vmatpush.msra.mxu0 %v33_v28 }
  0x23   :  { %102 = vmatpush.msra.mxu1 %v49_v29 }
  0x24   :  { %83 = vmatpush.msra.mxu0 %v32_v30 }
  0x25   :  { %103 = vmatpush.msra.mxu1 %v48_v31  ;;  %84 = vmatmul.f32.vlgmr.msra.gmra.mxu0 %v30_v32 }
  0x26   :  { %104 = vmatmul.f32.vlgmr.msra.gmra.mxu1 %v31_v33 }
  0xa2   :  { %v85_v35 = vpop.f32.mrf.mxu0 }
  0xa3   :  { %v105_v36 = vpop.f32.mrf.mxu1  ;;  %v86_v37 = vadd.f32 %v117_v34, %v85_v35 }
  0xa5   :  { %v106_v38 = vadd.f32 %v105_v36, %v86_v37 }
  0xa7   :  { %108 = vst [vmem:[%s185_s3] sm:$0xff] %v106_v38 }
  0xa8   :  { %113 = vsyncpa [#allocation3], 1 }

</bundles_post_ra>
